<compile_context>
chip_gen: v7x
topology: tpu7x:2x2x1
jax: 0.10.0
libtpu: 0.0.40
codegen_flags: <defaults>
</compile_context>

<pallas_src>
import functools
import math

import jax
import jax.numpy as jnp
from jax import lax
from jax.experimental import pallas as pl
from jax.experimental.pallas import tpu as pltpu


def _adain_kernel(scale_ref, shift_ref, x_ref, o_ref, *, eps):
    # One "row" == one (batch, channel) instance; spatial (H*W) is the lane dim.
    #   scale_ref : (tile_r, 1)   per-row (scale + 1), f32
    #   shift_ref : (tile_r, 1)   per-row shift, f32
    #   x_ref     : (tile_r, HW)  features (caller dtype)
    #   o_ref     : (tile_r, HW)
    x = x_ref[...].astype(jnp.float32)

    # InstanceNorm2d (affine=False, biased variance) over flattened spatial.
    # Two-pass (centered) variance kept for numerical stability; the kernel is
    # HBM-bound so the extra VALU pass is free filler.
    mean = jnp.mean(x, axis=-1, keepdims=True)
    xc = x - mean
    var = jnp.mean(xc * xc, axis=-1, keepdims=True)
    normed = xc * lax.rsqrt(var + eps)

    # AdaIN modulation: (rows, 1) columns broadcast over the lane dim.
    o_ref[...] = (normed * scale_ref[...] + shift_ref[...]).astype(o_ref.dtype)


def _pick_tile_rows(rows, hw, itemsize):
    """Pick the row-tile size from a VMEM byte budget."""
    # Budget for the double-buffered input + output blocks plus headroom for
    # ~3 tile-sized f32 intermediates (x cast, centered, normed). Conservative
    # enough for v7x's 64 MiB physical VMEM per TensorCore.
    vmem_budget = 32 * 1024 * 1024
    per_row = hw * itemsize * 2 * 2 + hw * 4 * 3
    tile_r = max(1, vmem_budget // per_row)

    if tile_r >= rows:
        tile_r = rows                      # single full-extent block
        # Give the "parallel" row axis >= 2 steps when possible so both v7x
        # TensorCores get work (tile must stay a multiple of 8 sublanes).
        if rows >= 16:
            tile_r = max(8, ((rows // 2) // 8) * 8)
    else:
        tile_r = max(8, (tile_r // 8) * 8)
    # TODO(synk): for very large H*W (tile_r pinned at 8 and still over
    # budget), add a second "arbitrary" grid axis over HW with running
    # sum/sumsq accumulators in VMEM scratch (needed for StyleGAN >=128x128
    # resolutions on v7x).
    return tile_r


def adain_forward(w, x, style_weight, style_bias, *, he_cons, eps=1e-5):
    """AdaIN.forward(w, x) — w: (N, w_size), x: (N, C, H, W) -> (N, C, H, W)."""
    N, C, H, Wsp = x.shape
    Nw, w_size = w.shape
    assert Nw == N
    assert style_weight.shape == (2 * C, w_size)
    assert style_bias.shape == (2 * C,)

    HW = H * Wsp
    rows = N * C                               # one instance-norm row per (n, c)

    # --- EqualizedLinear hoisted out of the kernel: O(N * 2C * w_size) FLOPs,
    # negligible, and removes all replicated style traffic from the hot loop.
    y = (jnp.dot(w.astype(jnp.float32), style_weight.T.astype(jnp.float32))
         + style_bias.astype(jnp.float32)) * jnp.float32(he_cons)      # (N, 2C)
    y = y.reshape(N, C, 2)                     # matches y.view(-1, C, 2, 1, 1)
    scale_p1 = (y[:, :, 0] + 1.0).reshape(rows, 1)   # (rows, 1) f32, "+1" folded
    shift = y[:, :, 1].reshape(rows, 1)              # (rows, 1) f32

    # Row-major flatten: row r == (n = r // C, c = r % C). Contiguous reshape.
    x2 = x.reshape(rows, HW)
    # TODO(synk): for HW < 128 (4x4 / 8x8 StyleGAN layers) pack 128//HW
    # channels per lane row with a segmented lane reduce to avoid masked
    # partial-lane loads/stores; current layout is correct but lane-sparse.

    itemsize = jnp.dtype(x.dtype).itemsize
    tile_r = _pick_tile_rows(rows, HW, itemsize)
    grid = (pl.cdiv(rows, tile_r),)

    # Scoped-VMEM limit sized above the budget used for tile selection so the
    # larger blocks compile on v5e (16 MiB default) and stay within v7x's
    # 64 MiB physical VMEM.
    vmem_limit = 48 * 1024 * 1024

    kern = functools.partial(_adain_kernel, eps=eps)
    out = pl.pallas_call(
        kern,
        out_shape=jax.ShapeDtypeStruct((rows, HW), x.dtype),
        grid_spec=pltpu.PrefetchScalarGridSpec(
            num_scalar_prefetch=0,
            grid=grid,
            in_specs=[
                pl.BlockSpec((tile_r, 1), lambda i: (i, 0)),
                pl.BlockSpec((tile_r, 1), lambda i: (i, 0)),
                pl.BlockSpec((tile_r, HW), lambda i: (i, 0)),
            ],
            out_specs=pl.BlockSpec((tile_r, HW), lambda i: (i, 0)),
        ),
        compiler_params=pltpu.CompilerParams(
            dimension_semantics=("parallel",),
            vmem_limit_bytes=vmem_limit,
        ),
    )(scale_p1, shift, x2)

    return out.reshape(N, C, H, Wsp)


def _adain_reference(w, x, style_weight, style_bias, he_cons, eps=1e-5):
    """Pure-JAX replica of the PyTorch AdaIN forward."""
    N, C, H, Wsp = x.shape
    y = (w @ style_weight.T + style_bias) * he_cons          # (N, 2C)
    y = y.reshape(N, C, 2)
    scale = y[:, :, 0].reshape(N, C, 1, 1)
    shift = y[:, :, 1].reshape(N, C, 1, 1)
    mean = x.mean(axis=(2, 3), keepdims=True)
    var = x.var(axis=(2, 3), keepdims=True)                  # biased, like InstanceNorm2d
    normed = (x - mean) / jnp.sqrt(var + eps)
    return normed * (scale + 1.0) + shift


if __name__ == "__main__":
    key = jax.random.PRNGKey(0)
    kx, kw, ksw = jax.random.split(key, 3)

    # AdaIN(w_size=8, channels=4); x: (batch=2, channels=4, 16, 16), w: (2, 8)
    N, C, H, W_sp = 2, 4, 16, 16
    w_size = 8

    x = jax.random.normal(kx, (N, C, H, W_sp), dtype=jnp.float32)
    w = jax.random.normal(kw, (N, w_size), dtype=jnp.float32)

    # EqualizedLinear init: weight ~ N(0,1), bias = 0, he_cons = sqrt(2/fan_in)
    style_weight = jax.random.normal(ksw, (2 * C, w_size), dtype=jnp.float32)
    style_bias = jnp.zeros((2 * C,), dtype=jnp.float32)
    he_cons = math.sqrt(2.0 / w_size)

    y = adain_forward(w, x, style_weight, style_bias, he_cons=he_cons)
    y = jax.block_until_ready(y)

    ref = _adain_reference(w, x, style_weight, style_bias, he_cons)
    assert y.shape == (N, C, H, W_sp)
    assert jnp.allclose(y, ref, atol=1e-4, rtol=1e-4)

    print("KERNEL_OK")
</pallas_src>

<mosaic_0001>
module attributes {stable_mosaic.version = 11 : i64} {
  func.func @_adain_kernel(%arg0: i32, %arg1: memref<8x1xf32, #tpu.memory_space<vmem>>, %arg2: memref<8x1xf32, #tpu.memory_space<vmem>>, %arg3: memref<8x256xf32, #tpu.memory_space<vmem>>, %arg4: memref<8x256xf32, #tpu.memory_space<vmem>>) attributes {dimension_semantics = [#tpu.dimension_semantics<parallel>], iteration_bounds = array<i64: 1>, scalar_prefetch = 0 : i64, scratch_operands = 0 : i64, tpu.core_type = #tpu.core_type<tc>, window_params = [{transform_indices = @transform_0, window_bounds = array<i64: 8, 1>}, {transform_indices = @transform_1, window_bounds = array<i64: 8, 1>}, {transform_indices = @transform_2, window_bounds = array<i64: 8, 256>}, {transform_indices = @transform_3, window_bounds = array<i64: 8, 256>}]} {
    %c0 = arith.constant 0 : index
    %c0_0 = arith.constant 0 : index
    %0 = vector.load %arg3[%c0, %c0_0] : memref<8x256xf32, #tpu.memory_space<vmem>>, vector<8x256xf32>
    %cst = arith.constant dense<0.000000e+00> : vector<8xf32>
    %1 = vector.multi_reduction <add>, %0, %cst [1] : vector<8x256xf32> to vector<8xf32>
    %2 = vector.shape_cast %1 : vector<8xf32> to vector<8x1xf32>
    %cst_1 = arith.constant 2.560000e+02 : f32
    %3 = vector.broadcast %cst_1 : f32 to vector<8x1xf32>
    %4 = arith.divf %2, %3 : vector<8x1xf32>
    %5 = vector.broadcast %4 : vector<8x1xf32> to vector<8x256xf32>
    %6 = arith.subf %0, %5 : vector<8x256xf32>
    %7 = arith.mulf %6, %6 : vector<8x256xf32>
    %cst_2 = arith.constant dense<0.000000e+00> : vector<8xf32>
    %8 = vector.multi_reduction <add>, %7, %cst_2 [1] : vector<8x256xf32> to vector<8xf32>
    %9 = vector.shape_cast %8 : vector<8xf32> to vector<8x1xf32>
    %cst_3 = arith.constant 2.560000e+02 : f32
    %10 = vector.broadcast %cst_3 : f32 to vector<8x1xf32>
    %11 = arith.divf %9, %10 : vector<8x1xf32>
    %cst_4 = arith.constant 9.99999974E-6 : f32
    %12 = vector.broadcast %cst_4 : f32 to vector<8x1xf32>
    %13 = arith.addf %11, %12 : vector<8x1xf32>
    %14 = math.rsqrt %13 : vector<8x1xf32>
    %15 = vector.broadcast %14 : vector<8x1xf32> to vector<8x256xf32>
    %16 = arith.mulf %6, %15 : vector<8x256xf32>
    %c0_5 = arith.constant 0 : index
    %c0_6 = arith.constant 0 : index
    %17 = vector.load %arg1[%c0_5, %c0_6] : memref<8x1xf32, #tpu.memory_space<vmem>>, vector<8x1xf32>
    %18 = vector.broadcast %17 : vector<8x1xf32> to vector<8x256xf32>
    %19 = arith.mulf %16, %18 : vector<8x256xf32>
    %c0_7 = arith.constant 0 : index
    %c0_8 = arith.constant 0 : index
    %20 = vector.load %arg2[%c0_7, %c0_8] : memref<8x1xf32, #tpu.memory_space<vmem>>, vector<8x1xf32>
    %21 = vector.broadcast %20 : vector<8x1xf32> to vector<8x256xf32>
    %22 = arith.addf %19, %21 : vector<8x256xf32>
    %c0_9 = arith.constant 0 : index
    %c0_10 = arith.constant 0 : index
    %23 = vector.load %arg4[%c0_9, %c0_10] : memref<8x256xf32, #tpu.memory_space<vmem>>, vector<8x256xf32>
    tpu.vector_store %arg4[%c0_9, %c0_10], %22 {strides = array<i32>} : memref<8x256xf32, #tpu.memory_space<vmem>>, vector<8x256xf32>,
    return
  }
  func.func @transform_0(%arg0: i32) -> (i32, i32) {
    %c0_i32 = arith.constant 0 : i32
    %c0_i32_0 = arith.constant 0 : i32
    return %arg0, %c0_i32 : i32, i32
  }
  func.func @transform_1(%arg0: i32) -> (i32, i32) {
    %c0_i32 = arith.constant 0 : i32
    %c0_i32_0 = arith.constant 0 : i32
    return %arg0, %c0_i32 : i32, i32
  }
  func.func @transform_2(%arg0: i32) -> (i32, i32) {
    %c0_i32 = arith.constant 0 : i32
    %c0_i32_0 = arith.constant 0 : i32
    return %arg0, %c0_i32 : i32, i32
  }
  func.func @transform_3(%arg0: i32) -> (i32, i32) {
    %c0_i32 = arith.constant 0 : i32
    %c0_i32_0 = arith.constant 0 : i32
    return %arg0, %c0_i32 : i32, i32
  }
}

</mosaic_0001>

<bundles_post_ra>
// kernel: tpu_custom_call.1
= control target key start
LH: loop header
LB: loop body
LE: loop exit
PB: predicated region body
PF: predicated region fallthrough
CT: control target
= control target key end

     0   :  { %s142_s0 = inlined_call_operand.vmem [shape: f32[8,1], index: 0, kind: input, shape index: {}]   ;;  %s143_s1 = inlined_call_operand.vmem [shape: f32[8,1], index: 1, kind: input, shape index: {}]   ;;  %s144_s2 = inlined_call_operand.vmem [shape: f32[8,256], index: 2, kind: input, shape index: {}]   ;;  %s145_s3 = inlined_call_operand.hbm [shape: f32[8,256], index: 3, kind: output, shape index: {}]  }
   0x1   :  { %v15_v0 = vld [vmem:[%s144_s2] sm:$0xff]  ;;  %v16_v1 = vld [vmem:[%s144_s2 + $0x8] sm:$0xff] }
   0x2   :  { %8 = vsyncpa [#allocation3], 0  ;;  %v17_v2 = vadd.f32 %v16_v1, %v15_v0  ;;  %v34_v3 = vld [vmem:[%s142_s0] sm:$0xff]  ;;  %v96_v4 = vmov 0   ;;  %s97_s0 = smov [#allocation2]  }
   0x3   :  { %68 = vset.pattern.permute.xlu1 %v96_v4  ;;  %69 = vset.pattern.permute.xlu0 %v96_v4  ;;  %v42_v5 = vld [vmem:[%s143_s1] sm:$0xff]  ;;  %s58_s2 = sshll.u32 %s97_s0, 4  ;;  %s59_s2 = int_to_ptr.vmem [resolvable:$true] %s58_s2 }
   0x4   :  { %18 = vadd.xlane.f32.xlu0 %v17_v2  ;;  %37 = vperm.xlu1 %68, %v34_v3   ;;  %s72_s1 = scalar_lea.vmem %s59_s2, 256  ;;  %p77_p1 = scmp.lt.s32.totalorder %s59_s2, %s59_s2 }
   0x5   :  { %p73_p0 = scmp.ne.s32.totalorder %s59_s2, %s72_s1  ;;  %p78_p2 = scmp.lt.s32.totalorder %s72_s1, %s72_s1 }
   0x7   :  { %p79_p3 = por %p78_p2, %p77_p1 }
   0x8   :  { %45 = vperm.xlu1 %68, %v42_v5  }
   0x9   :  { %p80_p4 = pnand %p79_p3, %p73_p0 }
  0x83   :  { %v38_v16 = vpop.permute.xlu1 %37 }
  0x87   :  { %v46_v22 = vpop.permute.xlu1 %45 }
  0x91   :  { %v19_v6 = vpop.xlane.xlu0 %18 }
  0x92   :  { %v21_v7 = vmul.f32 0.00390625, %v19_v6 }
  0x94   :  { %v22_v8 = vsub.f32 %v15_v0, %v21_v7  ;;  %v23_v9 = vsub.f32 %v16_v1, %v21_v7 }
  0x96   :  { %v24_v10 = vmul.f32 %v22_v8, %v22_v8  ;;  %v25_v11 = vmul.f32 %v23_v9, %v23_v9 }
  0x98   :  { %v26_v12 = vadd.f32 %v25_v11, %v24_v10 }
  0x9a   :  { %27 = vadd.xlane.f32.xlu0 %v26_v12 }
 0x127   :  { %v28_v13 = vpop.xlane.xlu0 %27 }
 0x128   :  { %v29_v14 = vmul.f32 0.00390625, %v28_v13 }
 0x12a   :  { %v30_v15 = vadd.f32 1e-05, %v29_v14 }
 0x12c   :  { %70 = vrsqrt.f32 %v30_v15 }
 0x136   :  { %v71_v17 = vpop.eup %70 }
 0x137   :  { %v32_v18 = vmul.f32 %v71_v17, %v22_v8  ;;  %v33_v19 = vmul.f32 %v71_v17, %v23_v9 }
 0x139   :  { %v40_v20 = vmul.f32 %v38_v16, %v32_v18  ;;  %v41_v21 = vmul.f32 %v38_v16, %v33_v19 }
 0x13b   :  { %v48_v23 = vadd.f32 %v46_v22, %v40_v20  ;;  %v49_v24 = vadd.f32 %v46_v22, %v41_v21 }
 0x13d   :  { %50 = vst [vmem:[#allocation2] sm:$0xff] %v48_v23  ;;  %51 = vst [vmem:[#allocation2 + $0x8] sm:$0xff] %v49_v24 }
 0x13e   :  { %83 = shalt.err (!%p80_p4)
}
 0x13f   :  { %s84_s22 = scalar_lea.hbm %s145_s3, 256 }
 0x140   :  { %p85_p5 = scmp.ne.s32.totalorder %s145_s3, %s84_s22  ;;  %p88_p6 = scmp.lt.u32.totalorder %s84_s22, %s145_s3 }
 0x142   :  { %p90_p7 = pnand %p88_p6, %p85_p5 }
 0x144   :  { %93 = shalt.err (!%p90_p7)
}
 0x145   :  { %61 = dma.vmem_to_hbm [thread:$0]  %s59_s2, 256, %s145_s3, [#allocation3]  }
 0x146   :  { %94 = dma.done.wait [#allocation3], 256  }
 0x147   :  { %95 = vsyncadd [#allocation3], 4294967040 }
 0x148   :  { %65 = vsyncpa [#allocation3], 1 }

</bundles_post_ra>
